<compile_context>
chip_gen: v5e
topology: v5e:2x2
jax: 0.10.0
libtpu: 0.0.40
codegen_flags: <defaults>
</compile_context>

<pallas_src>
import math

import jax
import jax.numpy as jnp
from jax import lax
from jax.experimental import pallas as pl
from jax.experimental.pallas import tpu as pltpu

# Problem sizes (small, consistent with the module's forward).
BATCH = 2
SEQ = 8
HIDDEN = 32
NUM_HEADS = 4
HEAD_DIM = HIDDEN // NUM_HEADS
DROPOUT_PROB = 0.1  # kept for parity with the module; identity in eval mode


def mhsa_kernel(x_ref, mask_ref, wqkv_ref, bqkv_ref, wo_ref, bo_ref, o_ref):
    """Whole forward pass in ONE grid step; batch folded into the sublane axis."""
    x = x_ref[...]                                               # (B*S, H)

    # Fused QKV projection: one (B*S, H) @ (H, 3H) MXU op + one bias add.
    qkv = jnp.dot(x, wqkv_ref[...],
                  preferred_element_type=jnp.float32) + bqkv_ref[...]
    q = qkv[:, 0:HIDDEN]                 # Q is pre-scaled by 1/sqrt(head_dim)
    k = qkv[:, HIDDEN:2 * HIDDEN]
    v = qkv[:, 2 * HIDDEN:3 * HIDDEN]

    # Per-(batch, head) score matmuls (MXU / vex slot).  No K transpose:
    # contract the head_dim axis of both operands.  The additive key mask is
    # applied here (tiny VPU adds); the expensive softmax pieces (XLU
    # reductions, EUP exp, divide) are batched once below.
    scores = []
    for b in range(BATCH):                                   # static unroll
        r0 = b * SEQ
        mask_row = mask_ref[b]                               # (1, S)
        for h in range(NUM_HEADS):                           # static unroll
            lo = h * HEAD_DIM
            qh = q[r0:r0 + SEQ, lo:lo + HEAD_DIM]            # (S, hd)
            kh = k[r0:r0 + SEQ, lo:lo + HEAD_DIM]            # (S, hd)
            s = lax.dot_general(qh, kh, (((1,), (1,)), ((), ())),
                                preferred_element_type=jnp.float32)  # (S, S)
            scores.append(s + mask_row)

    # ONE numerically-stable softmax over all B*NH score blocks stacked along
    # the sublane axis: a single max / exp / sum / divide instead of B*NH
    # separate 8-lane reduction chains.  Exact divide (no approx reciprocal).
    s_all = jnp.concatenate(scores, axis=0)                  # (B*NH*S, S)
    s_all = s_all - jnp.max(s_all, axis=-1, keepdims=True)
    p_all = jnp.exp(s_all)
    p_all = p_all / jnp.sum(p_all, axis=-1, keepdims=True)

    # TODO(synk): attention-probs dropout is identity here (eval mode); a
    # training-mode kernel would use pltpu.prng_seed / pltpu.prng_random_bits.

    # Per-(batch, head) context matmuls, re-assembled fully in registers
    # (no VMEM scratch round-trip): heads concatenated along lanes, batches
    # stacked along sublanes.
    ctx_rows = []
    for b in range(BATCH):
        r0 = b * SEQ
        heads = []
        for h in range(NUM_HEADS):
            lo = h * HEAD_DIM
            i = (b * NUM_HEADS + h) * SEQ
            p_bh = p_all[i:i + SEQ, :]                        # (S, S)
            vh = v[r0:r0 + SEQ, lo:lo + HEAD_DIM]             # (S, hd)
            heads.append(jnp.dot(p_bh, vh,
                                 preferred_element_type=jnp.float32))
        ctx_rows.append(jnp.concatenate(heads, axis=1))       # (S, H)
    ctx = jnp.concatenate(ctx_rows, axis=0)                   # (B*S, H)

    # Single output projection + bias over the full (B*S, H) context.
    o_ref[...] = jnp.dot(ctx, wo_ref[...],
                         preferred_element_type=jnp.float32) + bo_ref[...]


def fuse_params(params):
    """One-time weight fusion (hoisted out of the per-call path).

    Folds the 1/sqrt(head_dim) score scale into the Q weights/bias and fuses
    Q/K/V into a single (H, 3H) weight + (1, 3H) bias.
    """
    wq, bq, wk, bk, wv, bv, wo, bo = params
    scale = 1.0 / math.sqrt(HEAD_DIM)
    wqkv = jnp.concatenate([wq * scale, wk, wv], axis=1)            # (H, 3H)
    bqkv = jnp.concatenate([bq * scale, bk, bv]).reshape(1, 3 * HIDDEN)
    bo2 = bo.reshape(1, HIDDEN)
    return wqkv, bqkv, wo, bo2


def multi_head_self_attention(hidden_states, attention_mask, fused_params):
    """hidden_states: (B, S, H) f32; attention_mask: (B, 1, 1, S) f32 additive."""
    B, S, H = hidden_states.shape
    wqkv, bqkv, wo, bo2 = fused_params
    # Mask as (B, 1, S): lane axis stays on S.
    mask3 = attention_mask.reshape(B, 1, S).astype(jnp.float32)
    # Batch folded into the sublane axis so the fused QKV matmul sees B*S rows.
    x2d = hidden_states.reshape(B * S, H)

    out2d = pl.pallas_call(
        mhsa_kernel,
        out_shape=jax.ShapeDtypeStruct((B * S, H), jnp.float32),
        grid_spec=pltpu.PrefetchScalarGridSpec(
            num_scalar_prefetch=0,
            grid=(1,),
            in_specs=[
                pl.BlockSpec((B * S, H), lambda i: (0, 0)),       # activations
                pl.BlockSpec((B, 1, S), lambda i: (0, 0, 0)),     # additive mask
                pl.BlockSpec((H, 3 * H), lambda i: (0, 0)),       # fused QKV weight
                pl.BlockSpec((1, 3 * H), lambda i: (0, 0)),       # fused QKV bias
                pl.BlockSpec((H, H), lambda i: (0, 0)),           # out-proj weight
                pl.BlockSpec((1, H), lambda i: (0, 0)),           # out-proj bias
            ],
            out_specs=pl.BlockSpec((B * S, H), lambda i: (0, 0)),
        ),
        compiler_params=pltpu.CompilerParams(
            dimension_semantics=("arbitrary",)),
    )(x2d, mask3, wqkv, bqkv, wo, bo2)
    return out2d.reshape(B, S, H)


def init_params(key, hidden):
    """Deterministic parameter init. Weights stored as (in, out)."""
    keys = jax.random.split(key, 8)
    scale = 1.0 / math.sqrt(hidden)
    wq = jax.random.normal(keys[0], (hidden, hidden), jnp.float32) * scale
    bq = jax.random.normal(keys[1], (hidden,), jnp.float32) * 0.01
    wk = jax.random.normal(keys[2], (hidden, hidden), jnp.float32) * scale
    bk = jax.random.normal(keys[3], (hidden,), jnp.float32) * 0.01
    wv = jax.random.normal(keys[4], (hidden, hidden), jnp.float32) * scale
    bv = jax.random.normal(keys[5], (hidden,), jnp.float32) * 0.01
    wo = jax.random.normal(keys[6], (hidden, hidden), jnp.float32) * scale
    bo = jax.random.normal(keys[7], (hidden,), jnp.float32) * 0.01
    return (wq, bq, wk, bk, wv, bv, wo, bo)


def reference_mhsa(hidden_states, attention_mask, params):
    """Pure-JAX reference mirroring the PyTorch forward (eval-mode dropout).

    Uses Precision.HIGHEST so the f32 reference is not degraded by the TPU's
    default (reduced-precision) matmul path — keeps the comparison fair.
    """
    hp = jax.lax.Precision.HIGHEST
    wq, bq, wk, bk, wv, bv, wo, bo = params
    B, S, H = hidden_states.shape
    q = jnp.dot(hidden_states, wq, precision=hp) + bq
    k = jnp.dot(hidden_states, wk, precision=hp) + bk
    v = jnp.dot(hidden_states, wv, precision=hp) + bv

    def split(t):
        return t.reshape(B, S, NUM_HEADS, HEAD_DIM).transpose(0, 2, 1, 3)

    q, k, v = split(q), split(k), split(v)
    att = jnp.einsum("bhqd,bhkd->bhqk", q, k, precision=hp) / math.sqrt(HEAD_DIM)
    att = att + attention_mask
    probs = jax.nn.softmax(att, axis=-1)
    ctx = jnp.einsum("bhqk,bhkd->bhqd", probs, v, precision=hp)
    ctx = ctx.transpose(0, 2, 1, 3).reshape(B, S, H)
    return jnp.dot(ctx, wo, precision=hp) + bo


if __name__ == "__main__":
    key = jax.random.PRNGKey(0)
    k_x, k_mask, k_p = jax.random.split(key, 3)

    hidden_states = jax.random.normal(k_x, (BATCH, SEQ, HIDDEN), jnp.float32)
    # Additive BERT mask: 0 for attended positions, -10000 for padding.
    keep = (jax.random.uniform(k_mask, (BATCH, SEQ)) > 0.2).astype(jnp.float32)
    attention_mask = ((1.0 - keep) * -10000.0).reshape(BATCH, 1, 1, SEQ)

    params = init_params(k_p, HIDDEN)
    fused = fuse_params(params)   # hoisted: fused weights built once, not per call

    out = multi_head_self_attention(hidden_states, attention_mask, fused)
    out = jax.block_until_ready(out)

    ref = reference_mhsa(hidden_states, attention_mask, params)
    assert out.shape == (BATCH, SEQ, HIDDEN)
    # Tolerance covers the (chip-dependent) MXU f32 matmul decomposition inside
    # the kernel vs the HIGHEST-precision reference; structural bugs (mask,
    # head ordering, scale, biases) would produce O(0.1)+ errors.
    assert jnp.allclose(out, ref, atol=1e-2, rtol=1e-2), "mismatch vs reference"

    print("KERNEL_OK")
</pallas_src>

<mosaic_0001>
module attributes {stable_mosaic.version = 11 : i64} {
  func.func @mhsa_kernel(%arg0: i32, %arg1: memref<16x32xf32, #tpu.memory_space<vmem>>, %arg2: memref<2x1x8xf32, #tpu.memory_space<vmem>>, %arg3: memref<32x96xf32, #tpu.memory_space<vmem>>, %arg4: memref<1x96xf32, #tpu.memory_space<vmem>>, %arg5: memref<32x32xf32, #tpu.memory_space<vmem>>, %arg6: memref<1x32xf32, #tpu.memory_space<vmem>>, %arg7: memref<16x32xf32, #tpu.memory_space<vmem>>) attributes {dimension_semantics = [#tpu.dimension_semantics<arbitrary>], iteration_bounds = array<i64: 1>, scalar_prefetch = 0 : i64, scratch_operands = 0 : i64, tpu.core_type = #tpu.core_type<tc>, window_params = [{pipeline_mode = #tpu.pipeline_mode<synchronous>, transform_indices = @transform_0, window_bounds = array<i64: 16, 32>}, {pipeline_mode = #tpu.pipeline_mode<synchronous>, transform_indices = @transform_1, window_bounds = array<i64: 2, 1, 8>}, {pipeline_mode = #tpu.pipeline_mode<synchronous>, transform_indices = @transform_2, window_bounds = array<i64: 32, 96>}, {pipeline_mode = #tpu.pipeline_mode<synchronous>, transform_indices = @transform_3, window_bounds = array<i64: 1, 96>}, {pipeline_mode = #tpu.pipeline_mode<synchronous>, transform_indices = @transform_4, window_bounds = array<i64: 32, 32>}, {pipeline_mode = #tpu.pipeline_mode<synchronous>, transform_indices = @transform_5, window_bounds = array<i64: 1, 32>}, {pipeline_mode = #tpu.pipeline_mode<synchronous>, transform_indices = @transform_6, window_bounds = array<i64: 16, 32>}]} {
    %c0 = arith.constant 0 : index
    %c0_0 = arith.constant 0 : index
    %0 = vector.load %arg1[%c0, %c0_0] : memref<16x32xf32, #tpu.memory_space<vmem>>, vector<16x32xf32>
    %c0_1 = arith.constant 0 : index
    %c0_2 = arith.constant 0 : index
    %1 = vector.load %arg3[%c0_1, %c0_2] : memref<32x96xf32, #tpu.memory_space<vmem>>, vector<32x96xf32>
    %cst = arith.constant dense<0.000000e+00> : vector<16x96xf32>
    %2 = tpu.matmul %0, %1, %cst {dimension_numbers = #tpu.dot_dimension_numbers<[1], [0], [0], [1], [0, 0, 1, 1], [], []>} : vector<16x32xf32>, vector<32x96xf32>, vector<16x96xf32> -> vector<16x96xf32>
    %c0_3 = arith.constant 0 : index
    %c0_4 = arith.constant 0 : index
    %3 = vector.load %arg4[%c0_3, %c0_4] : memref<1x96xf32, #tpu.memory_space<vmem>>, vector<1x96xf32>
    %4 = vector.broadcast %3 : vector<1x96xf32> to vector<16x96xf32>
    %5 = arith.addf %2, %4 : vector<16x96xf32>
    %6 = vector.extract_strided_slice %5 {offsets = [0, 0], sizes = [16, 32], strides = [1, 1]} : vector<16x96xf32> to vector<16x32xf32>
    %7 = vector.extract_strided_slice %5 {offsets = [0, 32], sizes = [16, 32], strides = [1, 1]} : vector<16x96xf32> to vector<16x32xf32>
    %8 = vector.extract_strided_slice %5 {offsets = [0, 64], sizes = [16, 32], strides = [1, 1]} : vector<16x96xf32> to vector<16x32xf32>
    %c0_5 = arith.constant 0 : index
    %c0_6 = arith.constant 0 : index
    %c0_7 = arith.constant 0 : index
    %9 = vector.load %arg2[%c0_5, %c0_6, %c0_7] : memref<2x1x8xf32, #tpu.memory_space<vmem>>, vector<1x1x8xf32>
    %10 = vector.shape_cast %9 : vector<1x1x8xf32> to vector<1x8xf32>
    %11 = vector.extract_strided_slice %6 {offsets = [0, 0], sizes = [8, 8], strides = [1, 1]} : vector<16x32xf32> to vector<8x8xf32>
    %12 = vector.extract_strided_slice %7 {offsets = [0, 0], sizes = [8, 8], strides = [1, 1]} : vector<16x32xf32> to vector<8x8xf32>
    %cst_8 = arith.constant dense<0.000000e+00> : vector<8x8xf32>
    %13 = tpu.matmul %11, %12, %cst_8 {dimension_numbers = #tpu.dot_dimension_numbers<[1], [1], [0], [0], [0, 0, 1, 0], [], []>} : vector<8x8xf32>, vector<8x8xf32>, vector<8x8xf32> -> vector<8x8xf32>
    %14 = vector.broadcast %10 : vector<1x8xf32> to vector<8x8xf32>
    %15 = arith.addf %13, %14 : vector<8x8xf32>
    %16 = vector.extract_strided_slice %6 {offsets = [0, 8], sizes = [8, 8], strides = [1, 1]} : vector<16x32xf32> to vector<8x8xf32>
    %17 = vector.extract_strided_slice %7 {offsets = [0, 8], sizes = [8, 8], strides = [1, 1]} : vector<16x32xf32> to vector<8x8xf32>
    %cst_9 = arith.constant dense<0.000000e+00> : vector<8x8xf32>
    %18 = tpu.matmul %16, %17, %cst_9 {dimension_numbers = #tpu.dot_dimension_numbers<[1], [1], [0], [0], [0, 0, 1, 0], [], []>} : vector<8x8xf32>, vector<8x8xf32>, vector<8x8xf32> -> vector<8x8xf32>
    %19 = vector.broadcast %10 : vector<1x8xf32> to vector<8x8xf32>
    %20 = arith.addf %18, %19 : vector<8x8xf32>
    %21 = vector.extract_strided_slice %6 {offsets = [0, 16], sizes = [8, 8], strides = [1, 1]} : vector<16x32xf32> to vector<8x8xf32>
    %22 = vector.extract_strided_slice %7 {offsets = [0, 16], sizes = [8, 8], strides = [1, 1]} : vector<16x32xf32> to vector<8x8xf32>
    %cst_10 = arith.constant dense<0.000000e+00> : vector<8x8xf32>
    %23 = tpu.matmul %21, %22, %cst_10 {dimension_numbers = #tpu.dot_dimension_numbers<[1], [1], [0], [0], [0, 0, 1, 0], [], []>} : vector<8x8xf32>, vector<8x8xf32>, vector<8x8xf32> -> vector<8x8xf32>
    %24 = vector.broadcast %10 : vector<1x8xf32> to vector<8x8xf32>
    %25 = arith.addf %23, %24 : vector<8x8xf32>
    %26 = vector.extract_strided_slice %6 {offsets = [0, 24], sizes = [8, 8], strides = [1, 1]} : vector<16x32xf32> to vector<8x8xf32>
    %27 = vector.extract_strided_slice %7 {offsets = [0, 24], sizes = [8, 8], strides = [1, 1]} : vector<16x32xf32> to vector<8x8xf32>
    %cst_11 = arith.constant dense<0.000000e+00> : vector<8x8xf32>
    %28 = tpu.matmul %26, %27, %cst_11 {dimension_numbers = #tpu.dot_dimension_numbers<[1], [1], [0], [0], [0, 0, 1, 0], [], []>} : vector<8x8xf32>, vector<8x8xf32>, vector<8x8xf32> -> vector<8x8xf32>
    %29 = vector.broadcast %10 : vector<1x8xf32> to vector<8x8xf32>
    %30 = arith.addf %28, %29 : vector<8x8xf32>
    %c1 = arith.constant 1 : index
    %c0_12 = arith.constant 0 : index
    %c0_13 = arith.constant 0 : index
    %31 = vector.load %arg2[%c1, %c0_12, %c0_13] : memref<2x1x8xf32, #tpu.memory_space<vmem>>, vector<1x1x8xf32>
    %32 = vector.shape_cast %31 : vector<1x1x8xf32> to vector<1x8xf32>
    %33 = vector.extract_strided_slice %6 {offsets = [8, 0], sizes = [8, 8], strides = [1, 1]} : vector<16x32xf32> to vector<8x8xf32>
    %34 = vector.extract_strided_slice %7 {offsets = [8, 0], sizes = [8, 8], strides = [1, 1]} : vector<16x32xf32> to vector<8x8xf32>
    %cst_14 = arith.constant dense<0.000000e+00> : vector<8x8xf32>
    %35 = tpu.matmul %33, %34, %cst_14 {dimension_numbers = #tpu.dot_dimension_numbers<[1], [1], [0], [0], [0, 0, 1, 0], [], []>} : vector<8x8xf32>, vector<8x8xf32>, vector<8x8xf32> -> vector<8x8xf32>
    %36 = vector.broadcast %32 : vector<1x8xf32> to vector<8x8xf32>
    %37 = arith.addf %35, %36 : vector<8x8xf32>
    %38 = vector.extract_strided_slice %6 {offsets = [8, 8], sizes = [8, 8], strides = [1, 1]} : vector<16x32xf32> to vector<8x8xf32>
    %39 = vector.extract_strided_slice %7 {offsets = [8, 8], sizes = [8, 8], strides = [1, 1]} : vector<16x32xf32> to vector<8x8xf32>
    %cst_15 = arith.constant dense<0.000000e+00> : vector<8x8xf32>
    %40 = tpu.matmul %38, %39, %cst_15 {dimension_numbers = #tpu.dot_dimension_numbers<[1], [1], [0], [0], [0, 0, 1, 0], [], []>} : vector<8x8xf32>, vector<8x8xf32>, vector<8x8xf32> -> vector<8x8xf32>
    %41 = vector.broadcast %32 : vector<1x8xf32> to vector<8x8xf32>
    %42 = arith.addf %40, %41 : vector<8x8xf32>
    %43 = vector.extract_strided_slice %6 {offsets = [8, 16], sizes = [8, 8], strides = [1, 1]} : vector<16x32xf32> to vector<8x8xf32>
    %44 = vector.extract_strided_slice %7 {offsets = [8, 16], sizes = [8, 8], strides = [1, 1]} : vector<16x32xf32> to vector<8x8xf32>
    %cst_16 = arith.constant dense<0.000000e+00> : vector<8x8xf32>
    %45 = tpu.matmul %43, %44, %cst_16 {dimension_numbers = #tpu.dot_dimension_numbers<[1], [1], [0], [0], [0, 0, 1, 0], [], []>} : vector<8x8xf32>, vector<8x8xf32>, vector<8x8xf32> -> vector<8x8xf32>
    %46 = vector.broadcast %32 : vector<1x8xf32> to vector<8x8xf32>
    %47 = arith.addf %45, %46 : vector<8x8xf32>
    %48 = vector.extract_strided_slice %6 {offsets = [8, 24], sizes = [8, 8], strides = [1, 1]} : vector<16x32xf32> to vector<8x8xf32>
    %49 = vector.extract_strided_slice %7 {offsets = [8, 24], sizes = [8, 8], strides = [1, 1]} : vector<16x32xf32> to vector<8x8xf32>
    %cst_17 = arith.constant dense<0.000000e+00> : vector<8x8xf32>
    %50 = tpu.matmul %48, %49, %cst_17 {dimension_numbers = #tpu.dot_dimension_numbers<[1], [1], [0], [0], [0, 0, 1, 0], [], []>} : vector<8x8xf32>, vector<8x8xf32>, vector<8x8xf32> -> vector<8x8xf32>
    %51 = vector.broadcast %32 : vector<1x8xf32> to vector<8x8xf32>
    %52 = arith.addf %50, %51 : vector<8x8xf32>
    %53 = tpu.concatenate %15, %20, %25, %30, %37, %42, %47, %52 in 0 : vector<8x8xf32>, vector<8x8xf32>, vector<8x8xf32>, vector<8x8xf32>, vector<8x8xf32>, vector<8x8xf32>, vector<8x8xf32>, vector<8x8xf32> -> vector<64x8xf32>
    %cst_18 = arith.constant dense<0xFF800000> : vector<64xf32>
    %54 = vector.multi_reduction <maximumf>, %53, %cst_18 [1] : vector<64x8xf32> to vector<64xf32>
    %55 = vector.shape_cast %54 : vector<64xf32> to vector<64x1xf32>
    %56 = vector.broadcast %55 : vector<64x1xf32> to vector<64x8xf32>
    %57 = arith.subf %53, %56 : vector<64x8xf32>
    %58 = math.exp %57 : vector<64x8xf32>
    %cst_19 = arith.constant dense<0.000000e+00> : vector<64xf32>
    %59 = vector.multi_reduction <add>, %58, %cst_19 [1] : vector<64x8xf32> to vector<64xf32>
    %60 = vector.shape_cast %59 : vector<64xf32> to vector<64x1xf32>
    %61 = vector.broadcast %60 : vector<64x1xf32> to vector<64x8xf32>
    %62 = arith.divf %58, %61 : vector<64x8xf32>
    %63 = vector.extract_strided_slice %62 {offsets = [0, 0], sizes = [8, 8], strides = [1, 1]} : vector<64x8xf32> to vector<8x8xf32>
    %64 = vector.extract_strided_slice %8 {offsets = [0, 0], sizes = [8, 8], strides = [1, 1]} : vector<16x32xf32> to vector<8x8xf32>
    %cst_20 = arith.constant dense<0.000000e+00> : vector<8x8xf32>
    %65 = tpu.matmul %63, %64, %cst_20 {dimension_numbers = #tpu.dot_dimension_numbers<[1], [0], [0], [1], [0, 0, 1, 1], [], []>} : vector<8x8xf32>, vector<8x8xf32>, vector<8x8xf32> -> vector<8x8xf32>
    %66 = vector.extract_strided_slice %62 {offsets = [8, 0], sizes = [8, 8], strides = [1, 1]} : vector<64x8xf32> to vector<8x8xf32>
    %67 = vector.extract_strided_slice %8 {offsets = [0, 8], sizes = [8, 8], strides = [1, 1]} : vector<16x32xf32> to vector<8x8xf32>
    %cst_21 = arith.constant dense<0.000000e+00> : vector<8x8xf32>
    %68 = tpu.matmul %66, %67, %cst_21 {dimension_numbers = #tpu.dot_dimension_numbers<[1], [0], [0], [1], [0, 0, 1, 1], [], []>} : vector<8x8xf32>, vector<8x8xf32>, vector<8x8xf32> -> vector<8x8xf32>
    %69 = vector.extract_strided_slice %62 {offsets = [16, 0], sizes = [8, 8], strides = [1, 1]} : vector<64x8xf32> to vector<8x8xf32>
    %70 = vector.extract_strided_slice %8 {offsets = [0, 16], sizes = [8, 8], strides = [1, 1]} : vector<16x32xf32> to vector<8x8xf32>
    %cst_22 = arith.constant dense<0.000000e+00> : vector<8x8xf32>
    %71 = tpu.matmul %69, %70, %cst_22 {dimension_numbers = #tpu.dot_dimension_numbers<[1], [0], [0], [1], [0, 0, 1, 1], [], []>} : vector<8x8xf32>, vector<8x8xf32>, vector<8x8xf32> -> vector<8x8xf32>
    %72 = vector.extract_strided_slice %62 {offsets = [24, 0], sizes = [8, 8], strides = [1, 1]} : vector<64x8xf32> to vector<8x8xf32>
    %73 = vector.extract_strided_slice %8 {offsets = [0, 24], sizes = [8, 8], strides = [1, 1]} : vector<16x32xf32> to vector<8x8xf32>
    %cst_23 = arith.constant dense<0.000000e+00> : vector<8x8xf32>
    %74 = tpu.matmul %72, %73, %cst_23 {dimension_numbers = #tpu.dot_dimension_numbers<[1], [0], [0], [1], [0, 0, 1, 1], [], []>} : vector<8x8xf32>, vector<8x8xf32>, vector<8x8xf32> -> vector<8x8xf32>
    %75 = tpu.concatenate %65, %68, %71, %74 in 1 : vector<8x8xf32>, vector<8x8xf32>, vector<8x8xf32>, vector<8x8xf32> -> vector<8x32xf32>
    %76 = vector.extract_strided_slice %62 {offsets = [32, 0], sizes = [8, 8], strides = [1, 1]} : vector<64x8xf32> to vector<8x8xf32>
    %77 = vector.extract_strided_slice %8 {offsets = [8, 0], sizes = [8, 8], strides = [1, 1]} : vector<16x32xf32> to vector<8x8xf32>
    %cst_24 = arith.constant dense<0.000000e+00> : vector<8x8xf32>
    %78 = tpu.matmul %76, %77, %cst_24 {dimension_numbers = #tpu.dot_dimension_numbers<[1], [0], [0], [1], [0, 0, 1, 1], [], []>} : vector<8x8xf32>, vector<8x8xf32>, vector<8x8xf32> -> vector<8x8xf32>
    %79 = vector.extract_strided_slice %62 {offsets = [40, 0], sizes = [8, 8], strides = [1, 1]} : vector<64x8xf32> to vector<8x8xf32>
    %80 = vector.extract_strided_slice %8 {offsets = [8, 8], sizes = [8, 8], strides = [1, 1]} : vector<16x32xf32> to vector<8x8xf32>
    %cst_25 = arith.constant dense<0.000000e+00> : vector<8x8xf32>
    %81 = tpu.matmul %79, %80, %cst_25 {dimension_numbers = #tpu.dot_dimension_numbers<[1], [0], [0], [1], [0, 0, 1, 1], [], []>} : vector<8x8xf32>, vector<8x8xf32>, vector<8x8xf32> -> vector<8x8xf32>
    %82 = vector.extract_strided_slice %62 {offsets = [48, 0], sizes = [8, 8], strides = [1, 1]} : vector<64x8xf32> to vector<8x8xf32>
    %83 = vector.extract_strided_slice %8 {offsets = [8, 16], sizes = [8, 8], strides = [1, 1]} : vector<16x32xf32> to vector<8x8xf32>
    %cst_26 = arith.constant dense<0.000000e+00> : vector<8x8xf32>
    %84 = tpu.matmul %82, %83, %cst_26 {dimension_numbers = #tpu.dot_dimension_numbers<[1], [0], [0], [1], [0, 0, 1, 1], [], []>} : vector<8x8xf32>, vector<8x8xf32>, vector<8x8xf32> -> vector<8x8xf32>
    %85 = vector.extract_strided_slice %62 {offsets = [56, 0], sizes = [8, 8], strides = [1, 1]} : vector<64x8xf32> to vector<8x8xf32>
    %86 = vector.extract_strided_slice %8 {offsets = [8, 24], sizes = [8, 8], strides = [1, 1]} : vector<16x32xf32> to vector<8x8xf32>
    %cst_27 = arith.constant dense<0.000000e+00> : vector<8x8xf32>
    %87 = tpu.matmul %85, %86, %cst_27 {dimension_numbers = #tpu.dot_dimension_numbers<[1], [0], [0], [1], [0, 0, 1, 1], [], []>} : vector<8x8xf32>, vector<8x8xf32>, vector<8x8xf32> -> vector<8x8xf32>
    %88 = tpu.concatenate %78, %81, %84, %87 in 1 : vector<8x8xf32>, vector<8x8xf32>, vector<8x8xf32>, vector<8x8xf32> -> vector<8x32xf32>
    %89 = tpu.concatenate %75, %88 in 0 : vector<8x32xf32>, vector<8x32xf32> -> vector<16x32xf32>
    %c0_28 = arith.constant 0 : index
    %c0_29 = arith.constant 0 : index
    %90 = vector.load %arg5[%c0_28, %c0_29] : memref<32x32xf32, #tpu.memory_space<vmem>>, vector<32x32xf32>
    %cst_30 = arith.constant dense<0.000000e+00> : vector<16x32xf32>
    %91 = tpu.matmul %89, %90, %cst_30 {dimension_numbers = #tpu.dot_dimension_numbers<[1], [0], [0], [1], [0, 0, 1, 1], [], []>} : vector<16x32xf32>, vector<32x32xf32>, vector<16x32xf32> -> vector<16x32xf32>
    %c0_31 = arith.constant 0 : index
    %c0_32 = arith.constant 0 : index
    %92 = vector.load %arg6[%c0_31, %c0_32] : memref<1x32xf32, #tpu.memory_space<vmem>>, vector<1x32xf32>
    %93 = vector.broadcast %92 : vector<1x32xf32> to vector<16x32xf32>
    %94 = arith.addf %91, %93 : vector<16x32xf32>
    %c0_33 = arith.constant 0 : index
    %c0_34 = arith.constant 0 : index
    %95 = vector.load %arg7[%c0_33, %c0_34] : memref<16x32xf32, #tpu.memory_space<vmem>>, vector<16x32xf32>
    tpu.vector_store %arg7[%c0_33, %c0_34], %94 {strides = array<i32>} : memref<16x32xf32, #tpu.memory_space<vmem>>, vector<16x32xf32>,
    return
  }
  func.func @transform_0(%arg0: i32) -> (i32, i32) {
    %c0_i32 = arith.constant 0 : i32
    %c0_i32_0 = arith.constant 0 : i32
    %c0_i32_1 = arith.constant 0 : i32
    return %c0_i32, %c0_i32_0 : i32, i32
  }
  func.func @transform_1(%arg0: i32) -> (i32, i32, i32) {
    %c0_i32 = arith.constant 0 : i32
    %c0_i32_0 = arith.constant 0 : i32
    %c0_i32_1 = arith.constant 0 : i32
    %c0_i32_2 = arith.constant 0 : i32
    return %c0_i32, %c0_i32_0, %c0_i32_1 : i32, i32, i32
  }
  func.func @transform_2(%arg0: i32) -> (i32, i32) {
    %c0_i32 = arith.constant 0 : i32
    %c0_i32_0 = arith.constant 0 : i32
    %c0_i32_1 = arith.constant 0 : i32
    return %c0_i32, %c0_i32_0 : i32, i32
  }
  func.func @transform_3(%arg0: i32) -> (i32, i32) {
    %c0_i32 = arith.constant 0 : i32
    %c0_i32_0 = arith.constant 0 : i32
    %c0_i32_1 = arith.constant 0 : i32
    return %c0_i32, %c0_i32_0 : i32, i32
  }
  func.func @transform_4(%arg0: i32) -> (i32, i32) {
    %c0_i32 = arith.constant 0 : i32
    %c0_i32_0 = arith.constant 0 : i32
    %c0_i32_1 = arith.constant 0 : i32
    return %c0_i32, %c0_i32_0 : i32, i32
  }
  func.func @transform_5(%arg0: i32) -> (i32, i32) {
    %c0_i32 = arith.constant 0 : i32
    %c0_i32_0 = arith.constant 0 : i32
    %c0_i32_1 = arith.constant 0 : i32
    return %c0_i32, %c0_i32_0 : i32, i32
  }
  func.func @transform_6(%arg0: i32) -> (i32, i32) {
    %c0_i32 = arith.constant 0 : i32
    %c0_i32_0 = arith.constant 0 : i32
    %c0_i32_1 = arith.constant 0 : i32
    return %c0_i32, %c0_i32_0 : i32, i32
  }
}

</mosaic_0001>

<bundles_post_ra>
// kernel: tpu_custom_call.1
= control target key start
LH: loop header
LB: loop body
LE: loop exit
PB: predicated region body
PF: predicated region fallthrough
CT: control target
= control target key end

     0   :  { %11 = vsyncpa [#allocation3], 0  ;;  %s1338_s0 = inlined_call_operand.hbm [shape: f32[16,32], index: 0, kind: input, shape index: {}]   ;;  %s1339_s1 = inlined_call_operand.hbm [shape: f32[2,1,8], index: 1, kind: input, shape index: {}]   ;;  %s1340_s2 = inlined_call_operand.hbm [shape: f32[32,96], index: 2, kind: input, shape index: {}]   ;;  %s1341_s3 = inlined_call_operand.vmem [shape: f32[1,96], index: 3, kind: input, shape index: {}]   ;;  %s1342_s4 = inlined_call_operand.hbm [shape: f32[32,32], index: 4, kind: input, shape index: {}]   ;;  %s1343_s5 = inlined_call_operand.vmem [shape: f32[1,32], index: 5, kind: input, shape index: {}]   ;;  %s1344_s6 = inlined_call_operand.hbm [shape: f32[16,32], index: 6, kind: output, shape index: {}]  }
   0x1   :  { %12 = vsyncpa [#allocation6], 0 }
   0x2   :  { %13 = vsyncpa [#allocation9], 0  ;;  %s32_s23 = sshll.u32 %s1339_s1, 4  ;;  %s33_s23 = int_to_ptr.hbm [resolvable:$true] %s32_s23 }
   0x3   :  { %14 = vsyncpa [#allocation4], 0  ;;  %s1079_s24 = smov [#allocation5]   ;;  %s19_s28 = sshll.u32 %s1338_s0, 4  ;;  %s20_s28 = int_to_ptr.hbm [resolvable:$true] %s19_s28 }
   0x4   :  { %s34_s25 = sshll.u32 %s1079_s24, 4  ;;  %s1080_s29 = smov 16   ;;  %s35_s25 = int_to_ptr.vmem [resolvable:$true] %s34_s25 }
   0x5   :  { %s1081_s30 = smov 1   ;;  %s1082_s7 = smov [#allocation2]  }
   0x6   :  { %40 = dma.hbm_to_vmem [thread:$0]  %s33_s23, 32, %s35_s25, [#allocation6], %s1080_s29, %s1080_s29, %s1081_s30  }
   0x7   :  { %s21_s8 = sshll.u32 %s1082_s7, 4  ;;  %s1083_s9 = smov 128   ;;  %s22_s8 = int_to_ptr.vmem [resolvable:$true] %s21_s8 }
   0x8   :  { %s1084_s1 = smov 8   ;;  %s45_s12 = sshll.u32 %s1340_s2, 4  ;;  %s46_s12 = int_to_ptr.hbm [resolvable:$true] %s45_s12 }
   0x9   :  { %27 = dma.hbm_to_vmem [thread:$0]  %s20_s28, 256, %s22_s8, [#allocation3], %s1083_s9, %s1083_s9, %s1084_s1  }
   0xa   :  { %s1085_s0 = smov [#allocation7]   ;;  %s60_s16 = sshll.u32 %s1342_s4, 4  ;;  %s61_s16 = int_to_ptr.hbm [resolvable:$true] %s60_s16 }
   0xb   :  { %s47_s13 = sshll.u32 %s1085_s0, 4  ;;  %s1086_s17 = smov [#allocation8]   ;;  %s48_s13 = int_to_ptr.vmem [resolvable:$true] %s47_s13 }
   0xc   :  { %53 = dma.hbm_to_vmem [thread:$0]  %s46_s12, 512, %s48_s13, [#allocation6], %s1083_s9, %s1083_s9, %s1084_s1  }
   0xd   :  { %s62_s18 = sshll.u32 %s1086_s17, 4  ;;  %s63_s18 = int_to_ptr.vmem [resolvable:$true] %s62_s18 }
   0xe   :  { %68 = dma.hbm_to_vmem [thread:$0]  %s61_s16, 512, %s63_s18, [#allocation9], %s1083_s9, %s1083_s9, %s1084_s1  }
   0xf   :  { %1071 = dma.done.wait [#allocation3], 256  }
  0x10   :  { %1072 = vsyncadd [#allocation3], 4294967040 }
  0x11   :  { %1073 = dma.done.wait [#allocation6], 544  }
  0x12   :  { %1074 = vsyncadd [#allocation6], 4294966752 }
  0x13   :  { %1075 = dma.done.wait [#allocation9], 512  }
  0x14   :  { %1076 = vsyncadd [#allocation9], 4294966784  ;;  %v92_v0 = vld [vmem:[#allocation7 + $0x18] sm:$0xff]  ;;  %v91_v1 = vld [vmem:[#allocation7 + $0x10] sm:$0xff]  ;;  %vm97_vm0 = vcmask 261120   ;;  %s1087_s19 = smov 72  }
  0x15   :  { %116 = vmatpush.msra.mxu0 %v92_v0  ;;  %v90_v2 = vld [vmem:[#allocation7 + $0x8] sm:$0xff]  ;;  %v89_v3 = vld [vmem:[#allocation7] sm:$0xff]  ;;  %v88_v5 = vld [vmem:[#allocation2 + $0x8] sm:$0xff]  ;;  %s1088_s20 = smov 96   ;;  %s1089_s21 = smov 88   ;;  %vm134_vm1 = vcmask 64512  }
  0x16   :  { %v87_v4 = vld [vmem:[#allocation2] sm:$0xff]  ;;  %s1091_s22 = smov 104   ;;  %s1092_s23 = smov 80   ;;  %v916_v26 = vld [vmem:[#allocation5] ss:$0 sm:$0xff] }
  0x17   :  { %117 = vmatpush.msra.mxu0 %v91_v1  ;;  %v915_v6 = vld [vmem:[%s1341_s3] ss:$0 sm:$0xff]  ;;  %s1090_s3 = smov 120   ;;  %s1093_s24 = smov 112   ;;  %v917_v37 = vld [vmem:[#allocation5 + $0x1] ss:$0 sm:$0xff] }
  0x18   :  { %s1094_s25 = smov 40   ;;  %s1095_s26 = smov 48  }
  0x19   :  { %118 = vmatpush.msra.mxu0 %v90_v2  ;;  %s1096_s27 = smov 56   ;;  %s1097_s28 = smov 64  }
  0x1a   :  { %s1098_s30 = smov 24   ;;  %s1099_s8 = smov [#allocation10]  }
  0x1b   :  { %119 = vmatpush.msra.mxu0 %v89_v3  ;;  %s834_s10 = sshll.u32 %s1099_s8, 4  ;;  %s836_s0 = sshll.u32 %s1344_s6, 4  ;;  %s835_s10 = int_to_ptr.vmem [resolvable:$true] %s834_s10  ;;  %s837_s0 = int_to_ptr.hbm [resolvable:$true] %s836_s0 }
  0x1c   :  { %851 = vmatmul.msk.f32.vlgmr.msra.gmra.mxu0 %vm97_vm0, %v87_v4 }
  0x24   :  { %852 = vmatmul.msk.f32.gmra.mxu0 %vm97_vm0, %v88_v5 }
  0x99   :  { %v121_v7 = vpop.f32.mrf.mxu0 }
  0x9a   :  { %v1163_v8 = vadd.f32 %v915_v6, %v121_v7 }
  0x9c   :  { %217 = vrot.lane.b32.xlu2 %v1163_v8, %s1087_s19  ;;  %132 = vrot.lane.b32.xlu1 %v1163_v8, %s1088_s20 }
  0x9d   :  { %161 = vrot.lane.b32.xlu0 %v1163_v8, %s1089_s21 }
  0xa1   :  { %v124_v9 = vpop.f32.mrf.mxu0 }
  0xa2   :  { %v1168_v10 = vadd.f32 %v915_v6, %v124_v9 }
  0xa4   :  { %333 = vrot.lane.b32.xlu2 %v1168_v10, %s1087_s19  ;;  %249 = vrot.lane.b32.xlu1 %v1168_v10, %s1088_s20 }
  0xa5   :  { %159 = vrot.lane.b32.xlu0 %v1163_v8, %s1090_s3 }
  0xac   :  { %331 = vrot.lane.b32.xlu2 %v1168_v10, %s1091_s22  ;;  %189 = vrot.lane.b32.xlu1 %v1163_v8, %s1092_s23 }
  0xad   :  { %215 = vrot.lane.b32.xlu0 %v1163_v8, %s1091_s22 }
  0xb4   :  { %275 = vrot.lane.b32.xlu2 %v1168_v10, %s1090_s3  ;;  %187 = vrot.lane.b32.xlu1 %v1163_v8, %s1093_s24 }
  0xb5   :  { %277 = vrot.lane.b32.xlu0 %v1168_v10, %s1089_s21 }
  0xbc   :  { %303 = vrot.lane.b32.xlu1 %v1168_v10, %s1093_s24 }
  0xbd   :  { %305 = vrot.lane.b32.xlu0 %v1168_v10, %s1092_s23 }
  0xf6   :  { %v218_v11 = vpop.permute.xlu2 %217 }
  0xfe   :  { %v334_v14 = vpop.permute.xlu2 %333 }
 0x106   :  { %v332_v19 = vpop.permute.xlu2 %331 }
 0x10e   :  { %v133_v12 = vpop.permute.xlu1 %132  ;;  %v276_v22 = vpop.permute.xlu2 %275 }
 0x10f   :  { %v162_v13 = vpop.permute.xlu0 %161  ;;  %853 = vmatpush.xpose.msk.msra.mxu1 %vm134_vm1, %v133_v12 }
 0x110   :  { %855 = vmatpush.xpose.msk.msra.mxu2 %vm134_vm1, %v162_v13 }
 0x112   :  { %854 = vmatmul.msk.f32.vlgmr.msra.gmra.mxu1 %vm134_vm1, %v1163_v8 }
 0x113   :  { %859 = vmatpush.xpose.msk.msrb.mxu1 %vm134_vm1, %v218_v11 }
 0x116   :  { %v250_v15 = vpop.permute.xlu1 %249 }
 0x117   :  { %v160_v16 = vpop.permute.xlu0 %159  ;;  %861 = vmatpush.xpose.msk.msrb.mxu2 %vm134_vm1, %v250_v15 }
 0x118   :  { %856 = vmatmul.msk.f32.vlgmr.msra.gmra.mxu2 %vm134_vm1, %v160_v16 }
 0x11b   :  { %867 = vmatpush.xpose.msk.msra.mxu2 %vm134_vm1, %v334_v14 }
 0x11e   :  { %v190_v17 = vpop.permute.xlu1 %189 }
 0x11f   :  { %v216_v18 = vpop.permute.xlu0 %215  ;;  %857 = vmatpush.xpose.msk.msrb.mxu0 %vm134_vm1, %v190_v17 }
 0x120   :  { %860 = vmatmul.msk.f32.vlgmr.msrb.gmra.mxu1 %vm134_vm1, %v216_v18  ;;  %862 = vmatmul.msk.f32.vlgmr.msrb.gmra.mxu2 %vm134_vm1, %v1168_v10 }
 0x126   :  { %v188_v20 = vpop.permute.xlu1 %187 }
 0x127   :  { %v278_v21 = vpop.permute.xlu0 %277  ;;  %858 = vmatmul.msk.f32.vlgmr.msrb.gmra.mxu0 %vm134_vm1, %v188_v20 }
 0x128   :  { %863 = vmatpush.xpose.msk.msra.mxu3 %vm134_vm1, %v278_v21  ;;  %868 = vmatmul.msk.f32.vlgmr.msra.gmra.mxu2 %vm134_vm1, %v332_v19  ;;  %v900_v19 = vpack.i.bf16 %v1168_v10, %v1163_v8 }
 0x12b   :  { %864 = vmatmul.msk.f32.vlgmr.msra.gmra.mxu3 %vm134_vm1, %v276_v22 }
 0x12e   :  { %v304_v24 = vpop.permute.xlu1 %303 }
 0x12f   :  { %v306_v23 = vpop.permute.xlu0 %305 }
 0x130   :  { %865 = vmatpush.xpose.msk.msra.mxu1 %vm134_vm1, %v306_v23 }
 0x133   :  { %866 = vmatmul.msk.f32.vlgmr.msra.gmra.mxu1 %vm134_vm1, %v304_v24 }
 0x18f   :  { %v156_v25 = vpop.f32.mrf.mxu1 }
 0x190   :  { %v1202_v38 = vadd.f32 %v916_v26, %v156_v25 }
 0x192   :  { %v359_v43 = vsel %vm134_vm1, %v1202_v38, -inf }
 0x19b   :  { %v184_v27 = vpop.f32.mrf.mxu2 }
 0x19c   :  { %v185_v28 = vadd.f32 %v916_v26, %v184_v27 }
 0x19d   :  { %v240_v29 = vpop.f32.mrf.mxu1 }
 0x19e   :  { %v241_v30 = vadd.f32 %v916_v26, %v240_v29  ;;  %v362_v31 = vsel %vm134_vm1, %v185_v28, -inf }
 0x19f   :  { %363 = vmax.xlane.f32.xlu0 %v362_v31 }
 0x1a0   :  { %v368_v32 = vsel %vm134_vm1, %v241_v30, -inf }
 0x1a1   :  { %369 = vmax.xlane.f32.xlu2 %v368_v32 }
 0x1a3   :  { %v272_v33 = vpop.f32.mrf.mxu2 }
 0x1a4   :  { %v212_v34 = vpop.f32.mrf.mxu0  ;;  %v273_v49 = vadd.f32 %v917_v37, %v272_v33 }
 0x1a5   :  { %v213_v35 = vadd.f32 %v916_v26, %v212_v34 }
 0x1a6   :  { %v371_v50 = vsel %vm134_vm1, %v273_v49, -inf }
 0x1a7   :  { %v365_v36 = vsel %vm134_vm1, %v213_v35, -inf }
 0x1a8   :  { %366 = vmax.xlane.f32.xlu1 %v365_v36 }
 0x1ab   :  { %v356_v39 = vpop.f32.mrf.mxu2 }
 0x1ac   :  { %v357_v40 = vadd.f32 %v917_v37, %v356_v39 }
 0x1ae   :  { %v380_v41 = vsel %vm134_vm1, %v357_v40, -inf  ;;  %v300_v42 = vpop.f32.mrf.mxu3 }
 0x1af   :  { %381 = vmax.xlane.f32.xlu2 %v380_v41  ;;  %v301_v46 = vadd.f32 %v917_v37, %v300_v42 }
 0x1b0   :  { %v328_v44 = vpop.f32.mrf.mxu1  ;;  %360 = vmax.xlane.f32.xlu1 %v359_v43 }
 0x1b1   :  { %v329_v45 = vadd.f32 %v917_v37, %v328_v44  ;;  %v374_v48 = vsel %vm134_vm1, %v301_v46, -inf }
 0x1b3   :  { %v377_v47 = vsel %vm134_vm1, %v329_v45, -inf }
 0x1b4   :  { %378 = vmax.xlane.f32.xlu0 %v377_v47 }
 0x1b7   :  { %375 = vmax.xlane.f32.xlu2 %v374_v48 }
 0x1bf   :  { %372 = vmax.xlane.f32.xlu2 %v371_v50 }
 0x212   :  { %v364_v51 = vpop.xlane.xlu0 %363 }
 0x213   :  { %v384_v52 = vsub.f32 %v185_v28, %v364_v51 }
 0x214   :  { %v370_v53 = vpop.xlane.xlu2 %369 }
 0x215   :  { %v393_v54 = vmul.f32 1.442695, %v384_v52  ;;  %v386_v55 = vsub.f32 %v241_v30, %v370_v53 }
 0x217   :  { %919 = vpow2.f32 %v393_v54  ;;  %v397_v56 = vmul.f32 1.442695, %v386_v55 }
 0x219   :  { %921 = vpow2.f32 %v397_v56 }
 0x21b   :  { %v367_v57 = vpop.xlane.xlu1 %366 }
 0x21c   :  { %v385_v58 = vsub.f32 %v213_v35, %v367_v57 }
 0x21d   :  { %v1210_v59 = vpop.eup %919 }
 0x21e   :  { %v395_v60 = vmul.f32 1.442695, %v385_v58  ;;  %v410_v61 = vsel %vm134_vm1, %v1210_v59, 0.0 }
 0x21f   :  { %v1214_v62 = vpop.eup %921  ;;  %411 = vadd.xlane.f32.xlu1 %v410_v61 }
 0x220   :  { %923 = vpow2.f32 %v395_v60  ;;  %v416_v63 = vsel %vm134_vm1, %v1214_v62, 0.0 }
 0x221   :  { %417 = vadd.xlane.f32.xlu0 %v416_v63 }
 0x222   :  { %v382_v0 = vpop.xlane.xlu2 %381 }
 0x223   :  { %v390_v1 = vsub.f32 %v357_v40, %v382_v0  ;;  %v361_v20 = vpop.xlane.xlu1 %360 }
 0x224   :  { %v383_v21 = vsub.f32 %v1202_v38, %v361_v20 }
 0x225   :  { %v405_v2 = vmul.f32 1.442695, %v390_v1 }
 0x226   :  { %v1218_v3 = vpop.eup %923  ;;  %v391_v22 = vmul.f32 1.442695, %v383_v21 }
 0x227   :  { %925 = vpow2.f32 %v405_v2  ;;  %v379_v4 = vpop.xlane.xlu0 %378  ;;  %v413_v5 = vsel %vm134_vm1, %v1218_v3, 0.0 }
 0x228   :  { %v389_v6 = vsub.f32 %v329_v45, %v379_v4  ;;  %414 = vadd.xlane.f32.xlu2 %v413_v5 }
 0x22a   :  { %v403_v7 = vmul.f32 1.442695, %v389_v6  ;;  %v376_v9 = vpop.xlane.xlu2 %375 }
 0x22b   :  { %v388_v11 = vsub.f32 %v301_v46, %v376_v9 }
 0x22c   :  { %927 = vpow2.f32 %v403_v7 }
 0x22d   :  { %v1222_v12 = vpop.eup %925  ;;  %v401_v13 = vmul.f32 1.442695, %v388_v11 }
 0x22e   :  { %v428_v14 = vsel %vm134_vm1, %v1222_v12, 0.0 }
 0x22f   :  { %929 = vpow2.f32 %v401_v13  ;;  %429 = vadd.xlane.f32.xlu0 %v428_v14 }
 0x230   :  { %931 = vpow2.f32 %v391_v22 }
 0x232   :  { %v1226_v15 = vpop.eup %927  ;;  %v373_v23 = vpop.xlane.xlu2 %372 }
 0x233   :  { %v425_v16 = vsel %vm134_vm1, %v1226_v15, 0.0  ;;  %v387_v24 = vsub.f32 %v273_v49, %v373_v23 }
 0x234   :  { %426 = vadd.xlane.f32.xlu2 %v425_v16 }
 0x235   :  { %v1230_v17 = vpop.eup %929  ;;  %v399_v26 = vmul.f32 1.442695, %v387_v24 }
 0x236   :  { %v422_v18 = vsel %vm134_vm1, %v1230_v17, 0.0  ;;  %v1239_v25 = vpop.eup %931 }
 0x237   :  { %423 = vadd.xlane.f32.xlu1 %v422_v18  ;;  %v407_v27 = vsel %vm134_vm1, %v1239_v25, 0.0  ;;  %933 = vpow2.f32 %v399_v26 }
 0x23d   :  { %v1243_v28 = vpop.eup %933 }
 0x243   :  { %901 = vrot.lane.b32.xlu0 %v900_v19, %s1094_s25 }
 0x24c   :  { %911 = vrot.lane.b32.xlu2 %v900_v19, %s1095_s26 }
 0x250   :  { %906 = vrot.lane.b32.xlu1 %v900_v19, %s1096_s27 }
 0x254   :  { %551 = vrot.lane.b32.xlu2 %v1163_v8, %s1097_s28  ;;  %v419_v8 = vsel %vm134_vm1, %v1243_v28, 0.0 }
 0x25c   :  { %672 = vrot.lane.b32.xlu2 %v1168_v10, %s1097_s28 }
 0x26d   :  { %408 = vadd.xlane.f32.xlu0 %v407_v27 }
 0x27a   :  { %420 = vadd.xlane.f32.xlu1 %v419_v8 }
 0x292   :  { %v1247_v31 = vpop.xlane.xlu1 %411 }
 0x294   :  { %v418_v29 = vpop.xlane.xlu0 %417 }
 0x295   :  { %935 = vrcp.f32 %v418_v29  ;;  %v487_v54 = vand.u32 2147483648, %v418_v29  ;;  %vm481_vm7 = vweird.f32 %v418_v29  ;;  %v485_v56 = vand.u32 2147483647, %v418_v29 }
 0x297   :  { %v488_v6 = vor.u32 1.1754944e-38, %v487_v54  ;;  %vm486_vm9 = vcmp.eq.f32.partialorder %v485_v56, 8.507059e+37 }
 0x29b   :  { %v415_v10 = vpop.xlane.xlu2 %414  ;;  %v936_v30 = vpop.eup %935 }
 0x29c   :  { %937 = vrcp.f32 %v415_v10  ;;  %v477_v32 = vmul.f32 %v936_v30, %v418_v29  ;;  %v472_v41 = vand.u32 2147483648, %v415_v10  ;;  %vm466_vm3 = vweird.f32 %v415_v10 }
 0x29d   :  { %939 = vrcp.f32 %v1247_v31  ;;  %v470_v45 = vand.u32 2147483647, %v415_v10  ;;  %vm482_vm5 = vweird.f32 %v936_v30 }
 0x29e   :  { %v478_v36 = vsub.f32 1.0, %v477_v32  ;;  %v473_v50 = vor.u32 1.1754944e-38, %v472_v41  ;;  %vm1264_vm8 = vmor %vm481_vm7, %vm482_vm5  ;;  %vm451_vm5 = vweird.f32 %v1247_v31 }
 0x29f   :  { %vm471_vm6 = vcmp.eq.f32.partialorder %v470_v45, 8.507059e+37 }
 0x2a0   :  { %v479_v43 = vmul.f32 %v936_v30, %v478_v36  ;;  %v457_v36 = vand.u32 2147483648, %v1247_v31 }
 0x2a2   :  { %v938_v33 = vpop.eup %937  ;;  %v1250_v34 = vpop.xlane.xlu0 %429  ;;  %v480_v51 = vadd.f32 %v936_v30, %v479_v43  ;;  %v458_v41 = vor.u32 1.1754944e-38, %v457_v36 }
 0x2a3   :  { %v462_v35 = vmul.f32 %v938_v33, %v415_v10  ;;  %941 = vrcp.f32 %v1250_v34  ;;  %vm467_vm2 = vweird.f32 %v938_v33  ;;  %v1253_v40 = vpop.eup %939  ;;  %vm541_vm11 = vweird.f32 %v1250_v34 }
 0x2a4   :  { %vm468_vm4 = vmor %vm466_vm3, %vm467_vm2  ;;  %v447_v49 = vmul.f32 %v1253_v40, %v1247_v31  ;;  %v484_v1 = vsel %vm1264_vm8, %v936_v30, %v480_v51  ;;  %v547_v18 = vand.u32 2147483648, %v1250_v34  ;;  %v545_v26 = vand.u32 2147483647, %v1250_v34 }
 0x2a5   :  { %v463_v37 = vsub.f32 1.0, %v462_v35  ;;  %v489_v16 = vsel %vm486_vm9, %v488_v6, %v484_v1  ;;  %vm452_vm3 = vweird.f32 %v1253_v40 }
 0x2a6   :  { %v448_v60 = vsub.f32 1.0, %v447_v49  ;;  %v490_v29 = vmul.f32 %v1214_v62, %v489_v16  ;;  %v548_v62 = vor.u32 1.1754944e-38, %v547_v18 }
 0x2a7   :  { %v464_v38 = vmul.f32 %v938_v33, %v463_v37  ;;  %v427_v39 = vpop.xlane.xlu2 %426  ;;  %v455_v37 = vand.u32 2147483647, %v1247_v31 }
 0x2a8   :  { %943 = vrcp.f32 %v427_v39  ;;  %v532_v7 = vand.u32 2147483648, %v427_v39  ;;  %v530_v13 = vand.u32 2147483647, %v427_v39  ;;  %v449_v14 = vmul.f32 %v1253_v40, %v448_v60 }
 0x2a9   :  { %v1255_v42 = vpop.eup %941  ;;  %v465_v44 = vadd.f32 %v938_v33, %v464_v38  ;;  %vm526_vm13 = vweird.f32 %v427_v39  ;;  %vm456_vm7 = vcmp.eq.f32.partialorder %v455_v37, 8.507059e+37 }
 0x2aa   :  { %v537_v46 = vmul.f32 %v1255_v42, %v1250_v34  ;;  %v1259_v47 = vpop.xlane.xlu1 %423  ;;  %vm542_vm12 = vweird.f32 %v1255_v42  ;;  %v533_v21 = vor.u32 1.1754944e-38, %v532_v7  ;;  %vm531_vm15 = vcmp.eq.f32.partialorder %v530_v13, 8.507059e+37 }
 0x2ab   :  { %v469_v48 = vsel %vm468_vm4, %v938_v33, %v465_v44  ;;  %945 = vrcp.f32 %v1259_v47  ;;  %vm1286_vm2 = vmor %vm541_vm11, %vm542_vm12  ;;  %v450_v35 = vadd.f32 %v1253_v40, %v449_v14  ;;  %vm546_vm4 = vcmp.eq.f32.partialorder %v545_v26, 8.507059e+37  ;;  %v791_v26 = vld [vmem:[#allocation8] sm:$0xff] }
 0x2ac   :  { %v538_v52 = vsub.f32 1.0, %v537_v46  ;;  %v474_v55 = vsel %vm471_vm6, %v473_v50, %v469_v48  ;;  %vm453_vm6 = vmor %vm451_vm5, %vm452_vm3  ;;  %v517_v46 = vand.u32 2147483648, %v1259_v47  ;;  %vm511_vm9 = vweird.f32 %v1259_v47 }
 0x2ad   :  { %v475_v5 = vmul.f32 %v1218_v3, %v474_v55  ;;  %v515_v49 = vand.u32 2147483647, %v1259_v47 }
 0x2ae   :  { %v944_v53 = vpop.eup %943  ;;  %v539_v2 = vmul.f32 %v1255_v42, %v538_v52  ;;  %v518_v51 = vor.u32 1.1754944e-38, %v517_v46 }
 0x2af   :  { %v522_v57 = vmul.f32 %v944_v53, %v427_v39  ;;  %v912_v58 = vpop.permute.xlu2 %911  ;;  %vm527_vm10 = vweird.f32 %v944_v53  ;;  %vm516_vm11 = vcmp.eq.f32.partialorder %v515_v49, 8.507059e+37 }
 0x2b0   :  { %v914_v63 = vunpack.i.h.bf16 %v912_v58  ;;  %v913_v0 = vunpack.i.l.bf16 %v912_v58  ;;  %v540_v3 = vadd.f32 %v1255_v42, %v539_v2  ;;  %vm528_vm14 = vmor %vm526_vm13, %vm527_vm10 }
 0x2b1   :  { %v523_v4 = vsub.f32 1.0, %v522_v57  ;;  %v1272_v9 = vpop.eup %945 }
 0x2b2   :  { %624 = vmatpush.msrb.mxu1 %v913_v0  ;;  %v507_v22 = vmul.f32 %v1272_v9, %v1259_v47  ;;  %v544_v32 = vsel %vm1286_vm2, %v1255_v42, %v540_v3  ;;  %vm512_vm8 = vweird.f32 %v1272_v9 }
 0x2b3   :  { %v524_v11 = vmul.f32 %v944_v53, %v523_v4  ;;  %871 = vmatmul.msk.f32.vlgmr.msrb.gmra.mxu1 %vm134_vm1, %v475_v5  ;;  %v549_v38 = vsel %vm546_vm4, %v548_v62, %v544_v32  ;;  %vm513_vm10 = vmor %vm511_vm9, %vm512_vm8 }
 0x2b4   :  { %745 = vmatpush.msra.mxu1 %v914_v63  ;;  %v508_v34 = vsub.f32 1.0, %v507_v22  ;;  %v550_v43 = vmul.f32 %v1222_v12, %v549_v38 }
 0x2b5   :  { %v525_v19 = vadd.f32 %v944_v53, %v524_v11  ;;  %v902_v20 = vpop.permute.xlu0 %901 }
 0x2b6   :  { %v904_v23 = vunpack.i.h.bf16 %v902_v20  ;;  %v903_v24 = vunpack.i.l.bf16 %v902_v20  ;;  %v509_v39 = vmul.f32 %v1272_v9, %v508_v34 }
 0x2b7   :  { %v529_v27 = vsel %vm528_vm14, %v944_v53, %v525_v19  ;;  %v552_v8 = vpop.permute.xlu2 %551 }
 0x2b8   :  { %v534_v30 = vsel %vm531_vm15, %v533_v21, %v529_v27  ;;  %572 = vmatpush.msrb.mxu3 %v552_v8  ;;  %650 = vmatpush.msrb.mxu2 %v903_v24  ;;  %v510_v45 = vadd.f32 %v1272_v9, %v509_v39  ;;  %v792_v24 = vld [vmem:[#allocation8 + $0x8] sm:$0xff] }
 0x2b9   :  { %872 = vmatmul.msk.f32.vlgmr.msrb.gmra.mxu2 %vm134_vm1, %v490_v29  ;;  %v535_v33 = vmul.f32 %v1226_v15, %v534_v30  ;;  %v454_v15 = vsel %vm453_vm6, %v1253_v40, %v450_v35  ;;  %vm668_vm6 = vcmask 130048   ;;  %v918_v39 = vld [vmem:[%s1343_s5] ss:$0 sm:$0xff] }
 0x2ba   :  { %771 = vmatpush.msra.mxu2 %v904_v23  ;;  %v459_v44 = vsel %vm456_vm7, %v458_v41, %v454_v15  ;;  %v514_v50 = vsel %vm513_vm10, %v1272_v9, %v510_v45  ;;  %v793_v23 = vld [vmem:[#allocation8 + $0x10] sm:$0xff]  ;;  %vm670_vm7 = vcmask 195584  }
 0x2bb   :  { %875 = vmatmul.msk.f32.vlgmr.msra.gmra.mxu1 %vm134_vm1, %v535_v33  ;;  %v460_v12 = vmul.f32 %v1210_v59, %v459_v44  ;;  %v519_v52 = vsel %vm516_vm11, %v518_v51, %v514_v50 }
 0x2bc   :  { %v520_v53 = vmul.f32 %v1230_v17, %v519_v52 }
 0x2bf   :  { %v673_v42 = vpop.permute.xlu2 %672 }
 0x2c0   :  { %693 = vmatpush.msra.mxu3 %v673_v42 }
 0x2c1   :  { %876 = vmatmul.msk.f32.vlgmr.msra.gmra.mxu2 %vm134_vm1, %v550_v43 }
 0x2c2   :  { %v907_v31 = vpop.permute.xlu1 %906 }
 0x2c3   :  { %v909_v48 = vunpack.i.h.bf16 %v907_v31  ;;  %v908_v40 = vunpack.i.l.bf16 %v907_v31 }
 0x2c5   :  { %598 = vmatpush.msra.mxu0 %v908_v40 }
 0x2c6   :  { %870 = vmatmul.msk.f32.vlgmr.msra.gmra.mxu0 %vm134_vm1, %v460_v12 }
 0x2c7   :  { %719 = vmatpush.msrb.mxu0 %v909_v48 }
 0x2ce   :  { %874 = vmatmul.msk.f32.vlgmr.msrb.gmra.mxu0 %vm134_vm1, %v520_v53 }
 0x2e0   :  { %v409_v54 = vpop.xlane.xlu0 %408 }
 0x2e1   :  { %947 = vrcp.f32 %v409_v54  ;;  %v442_v59 = vand.u32 2147483648, %v409_v54  ;;  %v440_v58 = vand.u32 2147483647, %v409_v54  ;;  %vm436_vm13 = vweird.f32 %v409_v54 }
 0x2e3   :  { %v443_v63 = vor.u32 1.1754944e-38, %v442_v59  ;;  %vm441_vm15 = vcmp.eq.f32.partialorder %v440_v58, 8.507059e+37 }
 0x2e7   :  { %v948_v55 = vpop.eup %947 }
 0x2e8   :  { %v432_v47 = vmul.f32 %v948_v55, %v409_v54  ;;  %vm437_vm12 = vweird.f32 %v948_v55 }
 0x2e9   :  { %vm438_vm14 = vmor %vm436_vm13, %vm437_vm12 }
 0x2ea   :  { %v433_v56 = vsub.f32 1.0, %v432_v47 }
 0x2ec   :  { %v434_v57 = vmul.f32 %v948_v55, %v433_v56 }
 0x2ed   :  { %v421_v60 = vpop.xlane.xlu1 %420 }
 0x2ee   :  { %v435_v61 = vadd.f32 %v948_v55, %v434_v57  ;;  %949 = vrcp.f32 %v421_v60  ;;  %v502_v6 = vand.u32 2147483648, %v421_v60  ;;  %v500_v9 = vand.u32 2147483647, %v421_v60 }
 0x2ef   :  { %vm496_vm3 = vweird.f32 %v421_v60 }
 0x2f0   :  { %v439_v0 = vsel %vm438_vm14, %v948_v55, %v435_v61  ;;  %v503_v13 = vor.u32 1.1754944e-38, %v502_v6  ;;  %vm501_vm5 = vcmp.eq.f32.partialorder %v500_v9, 8.507059e+37 }
 0x2f1   :  { %v444_v17 = vsel %vm441_vm15, %v443_v63, %v439_v0 }
 0x2f2   :  { %v445_v1 = vmul.f32 %v1239_v25, %v444_v17 }
 0x2f4   :  { %v950_v2 = vpop.eup %949  ;;  %869 = vmatmul.msk.f32.vlgmr.msrb.gmra.mxu3 %vm134_vm1, %v445_v1 }
 0x2f5   :  { %v492_v4 = vmul.f32 %v950_v2, %v421_v60  ;;  %vm497_vm2 = vweird.f32 %v950_v2 }
 0x2f6   :  { %vm498_vm4 = vmor %vm496_vm3, %vm497_vm2 }
 0x2f7   :  { %v493_v5 = vsub.f32 1.0, %v492_v4 }
 0x2f9   :  { %v494_v7 = vmul.f32 %v950_v2, %v493_v5 }
 0x2fb   :  { %v495_v11 = vadd.f32 %v950_v2, %v494_v7 }
 0x2fd   :  { %v499_v14 = vsel %vm498_vm4, %v950_v2, %v495_v11 }
 0x2fe   :  { %v504_v16 = vsel %vm501_vm5, %v503_v13, %v499_v14 }
 0x2ff   :  { %v505_v18 = vmul.f32 %v1243_v28, %v504_v16  ;;  %v794_v28 = vld [vmem:[#allocation8 + $0x18] sm:$0xff] }
 0x300   :  { %817 = vmatpush.msrb.mxu3 %v794_v28 }
 0x301   :  { %873 = vmatmul.msk.f32.vlgmr.msra.gmra.mxu3 %vm134_vm1, %v505_v18 }
 0x302   :  { %818 = vmatpush.msrb.mxu3 %v793_v23 }
 0x304   :  { %819 = vmatpush.msrb.mxu3 %v792_v24 }
 0x306   :  { %820 = vmatpush.msrb.mxu3 %v791_v26 }
 0x330   :  { %v626_v25 = vpop.f32.mrf.mxu1 }
 0x331   :  { %660 = vrot.lane.b32.xlu2 %v626_v25, %s1080_s29 }
 0x338   :  { %v747_v3 = vpop.f32.mrf.mxu1 }
 0x339   :  { %781 = vrot.lane.b32.xlu1 %v747_v3, %s1080_s29 }
 0x33c   :  { %v652_v19 = vpop.f32.mrf.mxu2 }
 0x33d   :  { %664 = vrot.lane.b32.xlu0 %v652_v19, %s1098_s30 }
 0x343   :  { %v600_v20 = vpop.f32.mrf.mxu0 }
 0x344   :  { %656 = vrot.lane.b32.xlu2 %v600_v20, %s1084_s1  ;;  %v773_v22 = vpop.f32.mrf.mxu2 }
 0x34b   :  { %v721_v21 = vpop.f32.mrf.mxu0 }
 0x34c   :  { %777 = vrot.lane.b32.xlu2 %v721_v21, %s1084_s1 }
 0x354   :  { %785 = vrot.lane.b32.xlu2 %v773_v22, %s1098_s30 }
 0x377   :  { %v574_v29 = vpop.f32.mrf.mxu3 }
 0x384   :  { %v695_v34 = vpop.f32.mrf.mxu3 }
 0x38b   :  { %v661_v27 = vpop.permute.xlu2 %660 }
 0x39e   :  { %v657_v8 = vpop.permute.xlu2 %656 }
 0x39f   :  { %v667_v30 = vsel %vm134_vm1, %v574_v29, %v657_v8 }
 0x3a0   :  { %v669_v32 = vsel %vm668_vm6, %v667_v30, %v661_v27 }
 0x3a6   :  { %v778_v10 = vpop.permute.xlu2 %777 }
 0x3a7   :  { %v788_v37 = vsel %vm134_vm1, %v695_v34, %v778_v10 }
 0x3ab   :  { %v782_v62 = vpop.permute.xlu1 %781 }
 0x3ac   :  { %v789_v38 = vsel %vm668_vm6, %v788_v37, %v782_v62 }
 0x3ae   :  { %v786_v36 = vpop.permute.xlu2 %785 }
 0x3af   :  { %v665_v33 = vpop.permute.xlu0 %664  ;;  %v790_v15 = vsel %vm670_vm7, %v789_v38, %v786_v36 }
 0x3b0   :  { %v671_v35 = vsel %vm670_vm7, %v669_v32, %v665_v33 }
 0x3b1   :  { %877 = vmatmul.msk.f32.vlgmr.msrb.gmra.mxu3 %vm97_vm0, %v671_v35 }
 0x3b9   :  { %878 = vmatmul.msk.f32.gmra.mxu3 %vm97_vm0, %v790_v15 }
 0x434   :  { %v822_v41 = vpop.f32.mrf.mxu3 }
 0x435   :  { %v823_v42 = vadd.f32 %v918_v39, %v822_v41 }
 0x437   :  { %828 = vst.msk [vmem:[#allocation10] sm:$0xff] %vm97_vm0, %v823_v42 }
 0x43c   :  { %v825_v43 = vpop.f32.mrf.mxu3 }
 0x43d   :  { %v826_v44 = vadd.f32 %v918_v39, %v825_v43 }
 0x43f   :  { %829 = vst.msk [vmem:[#allocation10 + $0x8] sm:$0xff] %vm97_vm0, %v826_v44 }
 0x440   :  { %842 = dma.vmem_to_hbm [thread:$0]  %s835_s10, 256, %s837_s0, [#allocation4], %s1083_s9, %s1083_s9, %s1084_s1  }
 0x441   :  { %1077 = dma.done.wait [#allocation4], 256  }
 0x442   :  { %1078 = vsyncadd [#allocation4], 4294967040 }
 0x443   :  { %847 = vsyncpa [#allocation3], 1 }
 0x444   :  { %848 = vsyncpa [#allocation6], 1 }
 0x445   :  { %849 = vsyncpa [#allocation9], 1 }
 0x446   :  { %850 = vsyncpa [#allocation4], 1 }

</bundles_post_ra>
